<compile_context>
chip_gen: v7x
topology: tpu7x:2x2x1
jax: 0.10.0
libtpu: 0.0.40
codegen_flags: <defaults>
</compile_context>

<pallas_src>
import jax
import jax.numpy as jnp
from jax.experimental import pallas as pl
from jax.experimental.pallas import tpu as pltpu


# ----------------------------- main streaming kernel ------------------------

def _mean_kernel(feat_ref, w_ref, out_ref):
    # feat_ref: (TILE_B, TILE_C, HW) native dtype; w_ref: (TILE_C, HW) f32.
    feat = feat_ref[...].astype(jnp.float32)       # in-register upcast (free vs DMA)
    pred = feat * w_ref[...][None, :, :]
    out_ref[...] = jnp.mean(pred, axis=-1)         # f32 accumulation over H*W


def _pick_tile(full, bytes_per_unit, budget_bytes, align=8):
    """Largest divisor t of `full` with (t == full or t % align == 0) whose tile
    fits `budget_bytes`; falls back to the smallest layout-legal divisor."""
    best = None
    smallest_legal = full
    for t in range(1, full + 1):
        if full % t:
            continue
        if t != full and t % align:
            continue
        smallest_legal = min(smallest_legal, t)
        if t * bytes_per_unit <= budget_bytes:
            best = t
    return best if best is not None else smallest_legal


def orthor_mean(feat_nchw, weight):
    """feat_nchw: (B, C, H, W) any float dtype; weight: (1, C, H, W).
    Returns (B, C) float32 = (feat * weight).mean(-1).mean(-1)."""
    B, C, H, W = feat_nchw.shape
    assert weight.shape == (1, C, H, W)
    HW = H * W
    feat3 = feat_nchw.reshape(B, C, HW)                     # native dtype (bf16 ok)
    w2 = weight.reshape(C, HW).astype(jnp.float32)

    itemsize = jnp.dtype(feat3.dtype).itemsize
    # Per-buffer budgets: double-buffered feat (<=2*4 MiB) + weight (<=2*2 MiB)
    # + tiny output comfortably fit v5e's 16 MiB scoped default and v7x's 32 MiB.
    tile_c = _pick_tile(C, HW * max(4, itemsize), 2 * 1024 * 1024, align=8)
    tile_b = _pick_tile(B, tile_c * HW * itemsize, 4 * 1024 * 1024, align=8)

    grid = (C // tile_c, B // tile_b)                       # weight axis is slow

    return pl.pallas_call(
        _mean_kernel,
        out_shape=jax.ShapeDtypeStruct((B, C), jnp.float32),
        grid=grid,
        in_specs=[
            pl.BlockSpec((tile_b, tile_c, HW), lambda ci, bi: (bi, ci, 0)),
            pl.BlockSpec((tile_c, HW), lambda ci, bi: (ci, 0)),
        ],
        out_specs=pl.BlockSpec((tile_b, tile_c), lambda ci, bi: (bi, ci)),
        compiler_params=pltpu.CompilerParams(
            dimension_semantics=("parallel", "parallel")),
    )(feat3, w2)


# ----------------------------- cosine-similarity loss -----------------------

def _cos_loss_kernel(wg_ref, loss_ref):
    wg = wg_ref[...]                                                  # (G, D) f32
    inv_norm = jax.lax.rsqrt(jnp.sum(wg * wg, axis=-1, keepdims=True))  # EUP slot
    wn = wg * inv_norm
    # G is tiny: Gram matrix on the VPU (broadcast + lane reduce), no MXU pass.
    gram = jnp.sum(wn[:, None, :] * wn[None, :, :], axis=-1)          # (G, G)
    cos2 = gram * gram
    g = cos2.shape[0]
    ii = jax.lax.broadcasted_iota(jnp.int32, (g, g), 0)
    jj = jax.lax.broadcasted_iota(jnp.int32, (g, g), 1)
    cos2 = jnp.where(ii == jj, jnp.float32(0.0), cos2)                # fill_diagonal_(0)
    loss_ref[0, 0] = jnp.sum(cos2) / (g * g)                          # mean incl. diag


def cos_similarity_loss(weight, groups):
    wg = weight.reshape(groups, -1).astype(jnp.float32)
    loss = pl.pallas_call(
        _cos_loss_kernel,
        out_shape=jax.ShapeDtypeStruct((1, 1), jnp.float32),
        in_specs=[pl.BlockSpec(memory_space=pltpu.MemorySpace.VMEM)],
        out_specs=pl.BlockSpec(memory_space=pltpu.MemorySpace.VMEM),
    )(wg)
    return loss[0, 0]


# ----------------------------- module forward -------------------------------

def orthor_transform(feat_nchw, weight, groups):
    """Equivalent of OrthorTransform.forward: returns ((B, C) means, scalar loss)."""
    return orthor_mean(feat_nchw, weight), cos_similarity_loss(weight, groups)


# ----------------------------- reference & test ------------------------------

def _reference(feat_nchw, weight, groups):
    pred = feat_nchw.astype(jnp.float32) * weight.astype(jnp.float32)
    out = pred.mean(axis=-1).mean(axis=-1)
    wg = weight.reshape(groups, -1).astype(jnp.float32)
    wn = wg / jnp.linalg.norm(wg, axis=-1, keepdims=True)
    cos = wn @ wn.T
    cos2 = jnp.square(cos)
    cos2 = cos2 * (1.0 - jnp.eye(groups, dtype=cos2.dtype))
    return out, jnp.mean(cos2)


if __name__ == "__main__":
    B, C, HWdim, G = 2, 4, 16, 2  # batch, c_dim, feat_hw, groups

    key = jax.random.PRNGKey(0)
    kf, kw = jax.random.split(key)
    feat = jax.random.normal(kf, (B, C, HWdim, HWdim), dtype=jnp.float32)
    weight = jax.random.normal(kw, (1, C, HWdim, HWdim), dtype=jnp.float32)  # randn init

    out_mean, loss = orthor_transform(feat, weight, G)
    jax.block_until_ready((out_mean, loss))

    ref_mean, ref_loss = _reference(feat, weight, G)
    assert out_mean.shape == (B, C)
    assert jnp.allclose(out_mean, ref_mean, atol=1e-5, rtol=1e-5)
    assert jnp.allclose(loss, ref_loss, atol=1e-5, rtol=1e-5)

    # bf16 streaming path: feat is DMA'd in bf16 and upcast in-register; the
    # H*W reduction still accumulates in f32.
    feat_bf16 = feat.astype(jnp.bfloat16)
    out_bf16, _ = orthor_transform(feat_bf16, weight, G)
    jax.block_until_ready(out_bf16)
    ref_bf16, _ = _reference(feat_bf16, weight, G)
    assert jnp.allclose(out_bf16, ref_bf16, atol=1e-5, rtol=1e-5)

    print("KERNEL_OK")
</pallas_src>

<mosaic_0001>
module attributes {stable_mosaic.version = 11 : i64} {
  func.func @_mean_kernel(%arg0: i32, %arg1: i32, %arg2: memref<2x4x256xf32, #tpu.memory_space<vmem>>, %arg3: memref<4x256xf32, #tpu.memory_space<vmem>>, %arg4: memref<2x4xf32, #tpu.memory_space<vmem>>) attributes {dimension_semantics = [#tpu.dimension_semantics<parallel>, #tpu.dimension_semantics<parallel>], iteration_bounds = array<i64: 1, 1>, scalar_prefetch = 0 : i64, scratch_operands = 0 : i64, tpu.core_type = #tpu.core_type<tc>, window_params = [{transform_indices = @transform_0, window_bounds = array<i64: 2, 4, 256>}, {transform_indices = @transform_1, window_bounds = array<i64: 4, 256>}, {transform_indices = @transform_2, window_bounds = array<i64: 2, 4>}]} {
    %c0 = arith.constant 0 : index
    %c0_0 = arith.constant 0 : index
    %c0_1 = arith.constant 0 : index
    %0 = vector.load %arg2[%c0, %c0_0, %c0_1] : memref<2x4x256xf32, #tpu.memory_space<vmem>>, vector<2x4x256xf32>
    %c0_2 = arith.constant 0 : index
    %c0_3 = arith.constant 0 : index
    %1 = vector.load %arg3[%c0_2, %c0_3] : memref<4x256xf32, #tpu.memory_space<vmem>>, vector<4x256xf32>
    %2 = vector.shape_cast %1 : vector<4x256xf32> to vector<1x4x256xf32>
    %3 = vector.broadcast %2 : vector<1x4x256xf32> to vector<2x4x256xf32>
    %4 = arith.mulf %0, %3 : vector<2x4x256xf32>
    %cst = arith.constant dense<0.000000e+00> : vector<2x4xf32>
    %5 = vector.multi_reduction <add>, %4, %cst [2] : vector<2x4x256xf32> to vector<2x4xf32>
    %cst_4 = arith.constant 2.560000e+02 : f32
    %6 = vector.broadcast %cst_4 : f32 to vector<2x4xf32>
    %7 = arith.divf %5, %6 : vector<2x4xf32>
    %c0_5 = arith.constant 0 : index
    %c0_6 = arith.constant 0 : index
    %8 = vector.load %arg4[%c0_5, %c0_6] : memref<2x4xf32, #tpu.memory_space<vmem>>, vector<2x4xf32>
    tpu.vector_store %arg4[%c0_5, %c0_6], %7 {strides = array<i32>} : memref<2x4xf32, #tpu.memory_space<vmem>>, vector<2x4xf32>,
    return
  }
  func.func @transform_0(%arg0: i32, %arg1: i32) -> (i32, i32, i32) {
    %c0_i32 = arith.constant 0 : i32
    %c0_i32_0 = arith.constant 0 : i32
    return %arg1, %arg0, %c0_i32 : i32, i32, i32
  }
  func.func @transform_1(%arg0: i32, %arg1: i32) -> (i32, i32) {
    %c0_i32 = arith.constant 0 : i32
    %c0_i32_0 = arith.constant 0 : i32
    return %arg0, %c0_i32 : i32, i32
  }
  func.func @transform_2(%arg0: i32, %arg1: i32) -> (i32, i32) {
    %c0_i32 = arith.constant 0 : i32
    return %arg1, %arg0 : i32, i32
  }
}

</mosaic_0001>

<bundles_post_ra>
// kernel: tpu_custom_call.1
= control target key start
LH: loop header
LB: loop body
LE: loop exit
PB: predicated region body
PF: predicated region fallthrough
CT: control target
= control target key end

     0   :  { %7 = vsyncpa [#allocation3], 0  ;;  %s229_s0 = inlined_call_operand.hbm [shape: f32[2,4,256], index: 0, kind: input, shape index: {}]   ;;  %s230_s1 = inlined_call_operand.hbm [shape: f32[4,256], index: 1, kind: input, shape index: {}]   ;;  %s231_s2 = inlined_call_operand.hbm [shape: f32[2,4], index: 2, kind: output, shape index: {}]  }
   0x1   :  { %8 = vsyncpa [#allocation6], 0 }
   0x2   :  { %9 = vsyncpa [#allocation4], 0  ;;  %s173_s9 = smov [#allocation2]   ;;  %s101_s13 = scalar_lea.hbm %s229_s0, 256 }
   0x3   :  { %s15_s10 = sshll.u32 %s173_s9, 4  ;;  %p102_p0 = scmp.ne.s32.totalorder %s229_s0, %s101_s13  ;;  %s16_s10 = int_to_ptr.vmem [resolvable:$true] %s15_s10 }
   0x4   :  { %p105_p1 = scmp.lt.u32.totalorder %s101_s13, %s229_s0 }
   0x6   :  { %p107_p2 = pnand %p105_p1, %p102_p0 }
   0x8   :  { %110 = shalt.err (!%p107_p2)
}
   0x9   :  { %s111_s18 = scalar_lea.vmem %s16_s10, 256  ;;  %p116_p4 = scmp.lt.s32.totalorder %s16_s10, %s16_s10 }
   0xa   :  { %p112_p3 = scmp.ne.s32.totalorder %s16_s10, %s111_s18  ;;  %p117_p5 = scmp.lt.s32.totalorder %s111_s18, %s111_s18 }
   0xc   :  { %p118_p6 = por %p117_p5, %p116_p4 }
   0xe   :  { %p119_p7 = pnand %p118_p6, %p112_p3 }
  0x10   :  { %122 = shalt.err (!%p119_p7)
}
  0x11   :  { %s174_s19 = smov 128   ;;  %s175_s20 = smov 8  }
  0x12   :  { %21 = dma.hbm_to_vmem [thread:$0]  %s229_s0, 256, %s16_s10, [#allocation3], %s174_s19, %s174_s19, %s175_s20  }
  0x13   :  { %s176_s23 = smov [#allocation5]   ;;  %s123_s27 = scalar_lea.hbm %s230_s1, 128 }
  0x14   :  { %s28_s24 = sshll.u32 %s176_s23, 4  ;;  %p124_p8 = scmp.ne.s32.totalorder %s230_s1, %s123_s27  ;;  %s29_s24 = int_to_ptr.vmem [resolvable:$true] %s28_s24 }
  0x15   :  { %p127_p9 = scmp.lt.u32.totalorder %s123_s27, %s230_s1 }
  0x17   :  { %p129_p10 = pnand %p127_p9, %p124_p8 }
  0x19   :  { %132 = shalt.err (!%p129_p10)
}
  0x1a   :  { %s133_s4 = scalar_lea.vmem %s29_s24, 128  ;;  %p138_p12 = scmp.lt.s32.totalorder %s29_s24, %s29_s24 }
  0x1b   :  { %p134_p11 = scmp.ne.s32.totalorder %s29_s24, %s133_s4  ;;  %p139_p13 = scmp.lt.s32.totalorder %s133_s4, %s133_s4 }
  0x1d   :  { %p140_p0 = por %p139_p13, %p138_p12 }
  0x1f   :  { %p141_p1 = pnand %p140_p0, %p134_p11 }
  0x21   :  { %144 = shalt.err (!%p141_p1)
}
  0x22   :  { %31 = dma.hbm_to_vmem [thread:$0]  %s230_s1, 128, %s29_s24, [#allocation6]  }
  0x23   :  { %167 = dma.done.wait [#allocation3], 256  }
  0x24   :  { %168 = vsyncadd [#allocation3], 4294967040 }
  0x25   :  { %169 = dma.done.wait [#allocation6], 128  }
  0x26   :  { %170 = vsyncadd [#allocation6], 4294967168  ;;  %v38_v0 = vld [vmem:[#allocation2] sm:$0xff]  ;;  %v40_v1 = vld [vmem:[#allocation5] sm:$0xff]  ;;  %vm49_vm0 = vcmask 1043456   ;;  %v65_v13 = vlaneseq  ;;  %s177_s1 = smov [#allocation7]  }
  0x27   :  { %v39_v2 = vld [vmem:[#allocation2 + $0x8] sm:$0xff]  ;;  %v41_v3 = vmul.f32 %v40_v1, %v38_v0  ;;  %s86_s6 = sshll.u32 %s177_s1, 4  ;;  %vm75_vm1 = vcmask 1041409   ;;  %vm78_vm2 = vcmask 25600   ;;  %s87_s6 = int_to_ptr.vmem [resolvable:$true] %s86_s6 }
  0x28   :  { %v42_v4 = vmul.f32 %v40_v1, %v39_v2  ;;  %v66_v14 = vand.u32 127, %v65_v13  ;;  %v68_v15 = vshrl.u32 %v65_v13, 7  ;;  %s145_s7 = scalar_lea.vmem %s87_s6, 32  ;;  %p150_p3 = scmp.lt.s32.totalorder %s87_s6, %s87_s6 }
  0x29   :  { %v45_v5 = vcombine.high %v41_v3, %v41_v3  ;;  %v50_v6 = vsel %vm49_vm0, %v41_v3, 0.0  ;;  %p146_p2 = scmp.ne.s32.totalorder %s87_s6, %s145_s7  ;;  %p151_p4 = scmp.lt.s32.totalorder %s145_s7, %s145_s7 }
  0x2a   :  { %v46_v7 = vcombine.high %v42_v4, %v42_v4  ;;  %v55_v9 = vsel %vm49_vm0, %v42_v4, 0.0  ;;  %v69_v17 = vsub.s32 %v66_v14, %v68_v15 }
  0x2b   :  { %v51_v8 = vsel %vm49_vm0, %v45_v5, 0.0  ;;  %p152_p5 = por %p151_p4, %p150_p3 }
  0x2c   :  { %v56_v10 = vsel %vm49_vm0, %v46_v7, 0.0  ;;  %v52_v11 = vadd.f32 %v51_v8, %v50_v6 }
  0x2d   :  { %v57_v12 = vadd.f32 %v56_v10, %v55_v9  ;;  %p153_p6 = pnand %p152_p5, %p146_p2 }
  0x2e   :  { %53 = vadd.xlane.f32.xlu0 %v52_v11 }
  0x32   :  { %58 = vadd.xlane.f32.xlu0 %v57_v12 }
  0xbb   :  { %v54_v16 = vpop.xlane.xlu0 %53 }
  0xbc   :  { %v61_v18 = vmul.f32 0.00390625, %v54_v16 }
  0xbe   :  { %v70_v21 = vrot.slane %v61_v18, %v69_v17 }
  0xbf   :  { %v59_v19 = vpop.xlane.xlu0 %58 }
  0xc0   :  { %v62_v20 = vmul.f32 0.00390625, %v59_v19 }
  0xc2   :  { %v74_v22 = vrot.slane %v62_v20, %v69_v17 }
  0xc4   :  { %v76_v23 = vsel %vm75_vm1, %v74_v22, %v70_v21 }
  0xc5   :  { %79 = vst.msk [vmem:[#allocation7] sm:$0x3] %vm78_vm2, %v76_v23 }
  0xc6   :  { %156 = shalt.err (!%p153_p6)
}
  0xc7   :  { %s157_s10 = scalar_lea.hbm %s231_s2, 32 }
  0xc8   :  { %p158_p7 = scmp.ne.s32.totalorder %s231_s2, %s157_s10  ;;  %p161_p8 = scmp.lt.u32.totalorder %s157_s10, %s231_s2 }
  0xca   :  { %p163_p9 = pnand %p161_p8, %p158_p7 }
  0xcc   :  { %166 = shalt.err (!%p163_p9)
}
  0xcd   :  { %89 = dma.vmem_to_hbm [thread:$0]  %s87_s6, 32, %s231_s2, [#allocation4]  }
  0xce   :  { %171 = dma.done.wait [#allocation4], 32  }
  0xcf   :  { %172 = vsyncadd [#allocation4], 4294967264 }
  0xd0   :  { %93 = vsyncpa [#allocation3], 1 }
  0xd1   :  { %94 = vsyncpa [#allocation6], 1 }
  0xd2   :  { %95 = vsyncpa [#allocation4], 1 }

</bundles_post_ra>
